<compile_context>
chip_gen: v7x
topology: tpu7x:2x2x1
jax: 0.10.0
libtpu: 0.0.40
codegen_flags: <defaults>
</compile_context>

<pallas_src>
import math

import jax
import jax.numpy as jnp
from jax import lax
from jax.experimental import pallas as pl
from jax.experimental.pallas import tpu as pltpu

LN_EPS = 1e-12
LANE = 128
MXU_DTYPE = jnp.bfloat16


def _make_output_layer_kernel(n_sub):
    def kernel(x_ref, w1_ref, b1_ref, g_ref, beta_ref, w2_ref, b2_ref, o_ref):
        tm = x_ref.shape[0]
        ts = tm // n_sub
        # Resident operands, loaded/hoisted once per grid step.
        w1 = w1_ref[...]
        w2 = w2_ref[...]
        b1 = b1_ref[...].astype(jnp.float32)
        gamma = g_ref[...].astype(jnp.float32)
        beta = beta_ref[...].astype(jnp.float32)
        b2 = b2_ref[...].astype(jnp.float32)
        inv_n = 1.0 / w1_ref.shape[1]

        # Statically unrolled sub-tiles: lets the scheduler co-issue sub-tile
        # s+1's MXU pushes with sub-tile s's VPU/XLU LayerNorm work.
        for s in range(n_sub):
            lo, hi = s * ts, (s + 1) * ts
            # --- Linear(H -> 2H): bf16 MXU operands, f32 accumulation ---
            xs = x_ref[lo:hi, :].astype(w1.dtype)
            h = jnp.dot(xs, w1, preferred_element_type=jnp.float32) + b1
            # --- ReLU ---
            h = jnp.maximum(h, 0.0)
            # --- BertLayerNorm (TF style: eps inside sqrt), two-pass stats in f32 ---
            mean = jnp.sum(h, axis=-1, keepdims=True) * inv_n
            centered = h - mean
            var = jnp.sum(centered * centered, axis=-1, keepdims=True) * inv_n
            scale = gamma * lax.rsqrt(var + LN_EPS)          # EUP rsqrt, gamma folded in
            hn = centered * scale + beta
            # --- Dropout ---
            # TODO(synk): training-mode dropout (config.trans_drop) omitted; inference = identity.
            # --- Linear(2H -> num_answer): output dim pre-padded to lane width ---
            out = jnp.dot(hn.astype(w2.dtype), w2, preferred_element_type=jnp.float32) + b2
            o_ref[lo:hi, :] = out.astype(o_ref.dtype)

    return kernel


def prepare_params(params, mxu_dtype=MXU_DTYPE):
    """One-time parameter preparation (do NOT redo per forward call):
    cast matmul weights to bf16 and pad the output dim to a full 128-lane width."""
    w1, b1, gamma, beta, w2, b2 = params
    num_answer = w2.shape[1]
    a_pad = pl.cdiv(num_answer, LANE) * LANE
    if a_pad != num_answer:
        w2 = jnp.pad(w2, ((0, 0), (0, a_pad - num_answer)))
        b2 = jnp.pad(b2, ((0, 0), (0, a_pad - num_answer)))
    prepped = (w1.astype(mxu_dtype), b1, gamma, beta, w2.astype(mxu_dtype), b2)
    return prepped, num_answer


def output_layer(hidden_states, prepared_params, num_answer, *, tm=256):
    """hidden_states: [..., H]; prepared_params from prepare_params(); returns [..., num_answer]."""
    w1, b1, gamma, beta, w2p, b2p = prepared_params
    H = hidden_states.shape[-1]
    H2 = w1.shape[1]
    a_pad = w2p.shape[1]
    lead = hidden_states.shape[:-1]
    M = int(math.prod(lead)) if lead else 1
    x2d = hidden_states.reshape(M, H)

    # Clamp the row tile for tiny inputs (keep it a multiple of 8), no wrapper-side
    # row padding: the ragged tail is a Pallas boundary block.
    tm = min(tm, max(8, -(-M // 8) * 8))
    grid_m = pl.cdiv(M, tm)
    n_sub = 2 if (tm >= 256 and tm % 16 == 0) else 1

    x_bytes = jnp.dtype(hidden_states.dtype).itemsize
    w_bytes = jnp.dtype(w1.dtype).itemsize
    out_bytes = x_bytes

    # VMEM budget: single-buffered resident weights + double-buffered x/out tiles
    # + ~3 f32 [tm, H2] LN temporaries, with headroom; cap at 64 MiB (v7x-safe).
    resident = H * H2 * w_bytes + H2 * a_pad * w_bytes + 3 * H2 * 4 + a_pad * 4
    streamed = 2 * tm * H * x_bytes + 2 * tm * a_pad * out_bytes
    temps = 3 * tm * H2 * 4
    vmem_limit = int(min(max((resident + streamed + temps) * 7 // 5,
                             16 * 1024 * 1024), 64 * 1024 * 1024))

    rows = grid_m * tm
    cost = pl.CostEstimate(
        flops=2 * rows * H * H2 + 2 * rows * H2 * a_pad,
        transcendentals=rows,
        bytes_accessed=int(M * H * x_bytes + H * H2 * w_bytes
                           + H2 * a_pad * w_bytes + 3 * H2 * 4 + a_pad * 4
                           + M * a_pad * out_bytes),
    )

    def resident_spec(shape):
        # Constant index map -> fetched once; Buffered(1) -> no wasted 2nd buffer.
        return pl.BlockSpec(shape, lambda i: (0, 0), pipeline_mode=pl.Buffered(1))

    out2d = pl.pallas_call(
        _make_output_layer_kernel(n_sub),
        out_shape=jax.ShapeDtypeStruct((M, a_pad), hidden_states.dtype),
        grid_spec=pltpu.PrefetchScalarGridSpec(
            num_scalar_prefetch=0,
            grid=(grid_m,),
            in_specs=[
                pl.BlockSpec((tm, H), lambda i: (i, 0)),   # x row tile (streamed, double-buffered)
                resident_spec((H, H2)),                    # W1 (bf16, resident)
                resident_spec((1, H2)),                    # b1
                resident_spec((1, H2)),                    # LN gamma
                resident_spec((1, H2)),                    # LN beta
                resident_spec((H2, a_pad)),                # W2 (bf16, lane-padded, resident)
                resident_spec((1, a_pad)),                 # b2 (lane-padded)
            ],
            out_specs=pl.BlockSpec((tm, a_pad), lambda i: (i, 0)),
        ),
        compiler_params=pltpu.CompilerParams(
            dimension_semantics=("parallel",),
            vmem_limit_bytes=vmem_limit,
        ),
        cost_estimate=cost,
    )(x2d, w1, b1, gamma, beta, w2p, b2p)

    out2d = out2d[:, :num_answer]
    return out2d.reshape(*lead, num_answer)


def init_params(key, hidden_dim, num_answer=1, dtype=jnp.float32):
    H, H2 = hidden_dim, 2 * hidden_dim
    k1, k2, k3, k4 = jax.random.split(key, 4)
    w1 = jax.random.normal(k1, (H, H2), dtype) * 0.02
    b1 = jax.random.normal(k2, (1, H2), dtype) * 0.02
    gamma = jnp.ones((1, H2), dtype)   # BertLayerNorm.weight init = ones
    beta = jnp.zeros((1, H2), dtype)   # BertLayerNorm.bias init = zeros
    w2 = jax.random.normal(k3, (H2, num_answer), dtype) * 0.02
    b2 = jax.random.normal(k4, (1, num_answer), dtype) * 0.02
    return (w1, b1, gamma, beta, w2, b2)


def output_layer_ref(x, params):
    """Pure-JAX f32 reference matching the PyTorch OutputLayer forward (eval mode)."""
    w1, b1, gamma, beta, w2, b2 = params
    h = jnp.maximum(x @ w1 + b1, 0.0)
    u = jnp.mean(h, axis=-1, keepdims=True)
    s = jnp.mean((h - u) ** 2, axis=-1, keepdims=True)
    hn = (h - u) / jnp.sqrt(s + LN_EPS)
    hn = gamma * hn + beta
    return hn @ w2 + b2


if __name__ == "__main__":
    key = jax.random.PRNGKey(0)
    k_x, k_p = jax.random.split(key)

    batch, seq, hidden_dim, num_answer = 2, 8, 32, 1
    x = jax.random.normal(k_x, (batch, seq, hidden_dim), jnp.float32)
    params = init_params(k_p, hidden_dim, num_answer)

    prepped, n_ans = prepare_params(params)          # one-time bf16 cast + lane pad
    out = output_layer(x, prepped, n_ans)
    out = jax.block_until_ready(out)

    ref = output_layer_ref(x, params)
    assert out.shape == (batch, seq, num_answer), out.shape
    # bf16 MXU operands vs f32 reference -> loosened tolerance.
    assert jnp.allclose(out, ref, atol=2e-2, rtol=2e-2), "mismatch vs reference"

    print("KERNEL_OK")
</pallas_src>

<mosaic_0001>
module attributes {stable_mosaic.version = 11 : i64} {
  func.func @kernel(%arg0: i32, %arg1: memref<16x32xf32, #tpu.memory_space<vmem>>, %arg2: memref<32x64xbf16, #tpu.memory_space<vmem>>, %arg3: memref<1x64xf32, #tpu.memory_space<vmem>>, %arg4: memref<1x64xf32, #tpu.memory_space<vmem>>, %arg5: memref<1x64xf32, #tpu.memory_space<vmem>>, %arg6: memref<64x128xbf16, #tpu.memory_space<vmem>>, %arg7: memref<1x128xf32, #tpu.memory_space<vmem>>, %arg8: memref<16x128xf32, #tpu.memory_space<vmem>>) attributes {dimension_semantics = [#tpu.dimension_semantics<parallel>], iteration_bounds = array<i64: 1>, scalar_prefetch = 0 : i64, scratch_operands = 0 : i64, tpu.core_type = #tpu.core_type<tc>, window_params = [{transform_indices = @transform_0, window_bounds = array<i64: 16, 32>}, {pipeline_mode = #tpu.pipeline_mode<synchronous>, transform_indices = @transform_1, window_bounds = array<i64: 32, 64>}, {pipeline_mode = #tpu.pipeline_mode<synchronous>, transform_indices = @transform_2, window_bounds = array<i64: 1, 64>}, {pipeline_mode = #tpu.pipeline_mode<synchronous>, transform_indices = @transform_3, window_bounds = array<i64: 1, 64>}, {pipeline_mode = #tpu.pipeline_mode<synchronous>, transform_indices = @transform_4, window_bounds = array<i64: 1, 64>}, {pipeline_mode = #tpu.pipeline_mode<synchronous>, transform_indices = @transform_5, window_bounds = array<i64: 64, 128>}, {pipeline_mode = #tpu.pipeline_mode<synchronous>, transform_indices = @transform_6, window_bounds = array<i64: 1, 128>}, {transform_indices = @transform_7, window_bounds = array<i64: 16, 128>}]} {
    %c0 = arith.constant 0 : index
    %c0_0 = arith.constant 0 : index
    %0 = vector.load %arg2[%c0, %c0_0] : memref<32x64xbf16, #tpu.memory_space<vmem>>, vector<32x64xbf16>
    %c0_1 = arith.constant 0 : index
    %c0_2 = arith.constant 0 : index
    %1 = vector.load %arg6[%c0_1, %c0_2] : memref<64x128xbf16, #tpu.memory_space<vmem>>, vector<64x128xbf16>
    %c0_3 = arith.constant 0 : index
    %c0_4 = arith.constant 0 : index
    %2 = vector.load %arg3[%c0_3, %c0_4] : memref<1x64xf32, #tpu.memory_space<vmem>>, vector<1x64xf32>
    %c0_5 = arith.constant 0 : index
    %c0_6 = arith.constant 0 : index
    %3 = vector.load %arg4[%c0_5, %c0_6] : memref<1x64xf32, #tpu.memory_space<vmem>>, vector<1x64xf32>
    %c0_7 = arith.constant 0 : index
    %c0_8 = arith.constant 0 : index
    %4 = vector.load %arg5[%c0_7, %c0_8] : memref<1x64xf32, #tpu.memory_space<vmem>>, vector<1x64xf32>
    %c0_9 = arith.constant 0 : index
    %c0_10 = arith.constant 0 : index
    %5 = vector.load %arg7[%c0_9, %c0_10] : memref<1x128xf32, #tpu.memory_space<vmem>>, vector<1x128xf32>
    %c0_11 = arith.constant 0 : index
    %c0_12 = arith.constant 0 : index
    %6 = vector.load %arg1[%c0_11, %c0_12] : memref<16x32xf32, #tpu.memory_space<vmem>>, vector<16x32xf32>
    %7 = arith.truncf %6 : vector<16x32xf32> to vector<16x32xbf16>
    %cst = arith.constant dense<0.000000e+00> : vector<16x64xf32>
    %8 = tpu.matmul %7, %0, %cst {dimension_numbers = #tpu.dot_dimension_numbers<[1], [0], [0], [1], [0, 0, 1, 1], [], []>} : vector<16x32xbf16>, vector<32x64xbf16>, vector<16x64xf32> -> vector<16x64xf32>
    %9 = vector.broadcast %2 : vector<1x64xf32> to vector<16x64xf32>
    %10 = arith.addf %8, %9 : vector<16x64xf32>
    %cst_13 = arith.constant 0.000000e+00 : f32
    %11 = vector.broadcast %cst_13 : f32 to vector<16x64xf32>
    %12 = arith.maximumf %10, %11 : vector<16x64xf32>
    %cst_14 = arith.constant dense<0.000000e+00> : vector<16xf32>
    %13 = vector.multi_reduction <add>, %12, %cst_14 [1] : vector<16x64xf32> to vector<16xf32>
    %14 = vector.shape_cast %13 : vector<16xf32> to vector<16x1xf32>
    %cst_15 = arith.constant 1.562500e-02 : f32
    %15 = vector.broadcast %cst_15 : f32 to vector<16x1xf32>
    %16 = arith.mulf %14, %15 : vector<16x1xf32>
    %17 = vector.broadcast %16 : vector<16x1xf32> to vector<16x64xf32>
    %18 = arith.subf %12, %17 : vector<16x64xf32>
    %19 = arith.mulf %18, %18 : vector<16x64xf32>
    %cst_16 = arith.constant dense<0.000000e+00> : vector<16xf32>
    %20 = vector.multi_reduction <add>, %19, %cst_16 [1] : vector<16x64xf32> to vector<16xf32>
    %21 = vector.shape_cast %20 : vector<16xf32> to vector<16x1xf32>
    %cst_17 = arith.constant 1.562500e-02 : f32
    %22 = vector.broadcast %cst_17 : f32 to vector<16x1xf32>
    %23 = arith.mulf %21, %22 : vector<16x1xf32>
    %cst_18 = arith.constant 9.99999996E-13 : f32
    %24 = vector.broadcast %cst_18 : f32 to vector<16x1xf32>
    %25 = arith.addf %23, %24 : vector<16x1xf32>
    %26 = math.rsqrt %25 : vector<16x1xf32>
    %27 = vector.broadcast %3 : vector<1x64xf32> to vector<16x64xf32>
    %28 = vector.broadcast %26 : vector<16x1xf32> to vector<16x64xf32>
    %29 = arith.mulf %27, %28 : vector<16x64xf32>
    %30 = arith.mulf %18, %29 : vector<16x64xf32>
    %31 = vector.broadcast %4 : vector<1x64xf32> to vector<16x64xf32>
    %32 = arith.addf %30, %31 : vector<16x64xf32>
    %33 = arith.truncf %32 : vector<16x64xf32> to vector<16x64xbf16>
    %cst_19 = arith.constant dense<0.000000e+00> : vector<16x128xf32>
    %34 = tpu.matmul %33, %1, %cst_19 {dimension_numbers = #tpu.dot_dimension_numbers<[1], [0], [0], [1], [0, 0, 1, 1], [], []>} : vector<16x64xbf16>, vector<64x128xbf16>, vector<16x128xf32> -> vector<16x128xf32>
    %35 = vector.broadcast %5 : vector<1x128xf32> to vector<16x128xf32>
    %36 = arith.addf %34, %35 : vector<16x128xf32>
    %c0_20 = arith.constant 0 : index
    %c0_21 = arith.constant 0 : index
    %37 = vector.load %arg8[%c0_20, %c0_21] : memref<16x128xf32, #tpu.memory_space<vmem>>, vector<16x128xf32>
    tpu.vector_store %arg8[%c0_20, %c0_21], %36 {strides = array<i32>} : memref<16x128xf32, #tpu.memory_space<vmem>>, vector<16x128xf32>,
    return
  }
  func.func @transform_0(%arg0: i32) -> (i32, i32) {
    %c0_i32 = arith.constant 0 : i32
    %c0_i32_0 = arith.constant 0 : i32
    return %arg0, %c0_i32 : i32, i32
  }
  func.func @transform_1(%arg0: i32) -> (i32, i32) {
    %c0_i32 = arith.constant 0 : i32
    %c0_i32_0 = arith.constant 0 : i32
    %c0_i32_1 = arith.constant 0 : i32
    return %c0_i32, %c0_i32_0 : i32, i32
  }
  func.func @transform_2(%arg0: i32) -> (i32, i32) {
    %c0_i32 = arith.constant 0 : i32
    %c0_i32_0 = arith.constant 0 : i32
    %c0_i32_1 = arith.constant 0 : i32
    return %c0_i32, %c0_i32_0 : i32, i32
  }
  func.func @transform_3(%arg0: i32) -> (i32, i32) {
    %c0_i32 = arith.constant 0 : i32
    %c0_i32_0 = arith.constant 0 : i32
    %c0_i32_1 = arith.constant 0 : i32
    return %c0_i32, %c0_i32_0 : i32, i32
  }
  func.func @transform_4(%arg0: i32) -> (i32, i32) {
    %c0_i32 = arith.constant 0 : i32
    %c0_i32_0 = arith.constant 0 : i32
    %c0_i32_1 = arith.constant 0 : i32
    return %c0_i32, %c0_i32_0 : i32, i32
  }
  func.func @transform_5(%arg0: i32) -> (i32, i32) {
    %c0_i32 = arith.constant 0 : i32
    %c0_i32_0 = arith.constant 0 : i32
    %c0_i32_1 = arith.constant 0 : i32
    return %c0_i32, %c0_i32_0 : i32, i32
  }
  func.func @transform_6(%arg0: i32) -> (i32, i32) {
    %c0_i32 = arith.constant 0 : i32
    %c0_i32_0 = arith.constant 0 : i32
    %c0_i32_1 = arith.constant 0 : i32
    return %c0_i32, %c0_i32_0 : i32, i32
  }
  func.func @transform_7(%arg0: i32) -> (i32, i32) {
    %c0_i32 = arith.constant 0 : i32
    %c0_i32_0 = arith.constant 0 : i32
    return %arg0, %c0_i32 : i32, i32
  }
}

</mosaic_0001>

<bundles_post_ra>
// kernel: tpu_custom_call.1
= control target key start
LH: loop header
LB: loop body
LE: loop exit
PB: predicated region body
PF: predicated region fallthrough
CT: control target
= control target key end

     0   :  { %12 = vsyncpa [#allocation3], 0  ;;  %s572_s0 = inlined_call_operand.hbm [shape: f32[16,32], index: 0, kind: input, shape index: {}]   ;;  %s573_s1 = inlined_call_operand.hbm [shape: bf16[32,64], index: 1, kind: input, shape index: {}]   ;;  %s574_s2 = inlined_call_operand.vmem [shape: f32[1,64], index: 2, kind: input, shape index: {}]   ;;  %s575_s3 = inlined_call_operand.vmem [shape: f32[1,64], index: 3, kind: input, shape index: {}]   ;;  %s576_s4 = inlined_call_operand.vmem [shape: f32[1,64], index: 4, kind: input, shape index: {}]   ;;  %s577_s5 = inlined_call_operand.hbm [shape: bf16[64,128], index: 5, kind: input, shape index: {}]   ;;  %s578_s6 = inlined_call_operand.vmem [shape: f32[1,128], index: 6, kind: input, shape index: {}]   ;;  %s579_s7 = inlined_call_operand.hbm [shape: f32[16,128], index: 7, kind: output, shape index: {}]  }
   0x1   :  { %13 = vsyncpa [#allocation6], 0 }
   0x2   :  { %14 = vsyncpa [#allocation4], 0  ;;  %s445_s24 = smov [#allocation5]   ;;  %s351_s28 = scalar_lea.hbm %s573_s1, 256 }
   0x3   :  { %s32_s25 = sshll.u32 %s445_s24, 4  ;;  %p352_p0 = scmp.ne.s32.totalorder %s573_s1, %s351_s28  ;;  %s33_s25 = int_to_ptr.vmem [resolvable:$true] %s32_s25 }
   0x4   :  { %p355_p1 = scmp.lt.u32.totalorder %s351_s28, %s573_s1 }
   0x6   :  { %p357_p2 = pnand %p355_p1, %p352_p0 }
   0x8   :  { %360 = shalt.err (!%p357_p2)
}
   0x9   :  { %s361_s10 = scalar_lea.vmem %s33_s25, 256  ;;  %p366_p4 = scmp.lt.s32.totalorder %s33_s25, %s33_s25 }
   0xa   :  { %p362_p3 = scmp.ne.s32.totalorder %s33_s25, %s361_s10  ;;  %p367_p5 = scmp.lt.s32.totalorder %s361_s10, %s361_s10 }
   0xc   :  { %p368_p6 = por %p367_p5, %p366_p4 }
   0xe   :  { %p369_p7 = pnand %p368_p6, %p362_p3 }
  0x10   :  { %372 = shalt.err (!%p369_p7)
}
  0x11   :  { %s446_s11 = smov 64   ;;  %s447_s12 = smov 4  }
  0x12   :  { %38 = dma.hbm_to_vmem [thread:$0]  %s573_s1, 256, %s33_s25, [#allocation6], %s446_s11, %s446_s11, %s447_s12  }
  0x13   :  { %s448_s15 = smov [#allocation2]   ;;  %s373_s19 = scalar_lea.hbm %s572_s0, 256 }
  0x14   :  { %s20_s16 = sshll.u32 %s448_s15, 4  ;;  %p374_p8 = scmp.ne.s32.totalorder %s572_s0, %s373_s19  ;;  %s21_s16 = int_to_ptr.vmem [resolvable:$true] %s20_s16 }
  0x15   :  { %p377_p9 = scmp.lt.u32.totalorder %s373_s19, %s572_s0 }
  0x17   :  { %p379_p10 = pnand %p377_p9, %p374_p8 }
  0x19   :  { %382 = shalt.err (!%p379_p10)
}
  0x1a   :  { %s383_s24 = scalar_lea.vmem %s21_s16, 256  ;;  %p388_p12 = scmp.lt.s32.totalorder %s21_s16, %s21_s16 }
  0x1b   :  { %p384_p11 = scmp.ne.s32.totalorder %s21_s16, %s383_s24  ;;  %p389_p13 = scmp.lt.s32.totalorder %s383_s24, %s383_s24 }
  0x1d   :  { %p390_p0 = por %p389_p13, %p388_p12 }
  0x1f   :  { %p391_p1 = pnand %p390_p0, %p384_p11 }
  0x21   :  { %394 = shalt.err (!%p391_p1)
}
  0x22   :  { %s449_s1 = smov 128   ;;  %s450_s25 = smov 8  }
  0x23   :  { %26 = dma.hbm_to_vmem [thread:$0]  %s572_s0, 256, %s21_s16, [#allocation3], %s449_s1, %s449_s1, %s450_s25  }
  0x24   :  { %s451_s28 = smov [#allocation7]   ;;  %s395_s9 = scalar_lea.hbm %s577_s5, 512 }
  0x25   :  { %s50_s29 = sshll.u32 %s451_s28, 4  ;;  %p396_p2 = scmp.ne.s32.totalorder %s577_s5, %s395_s9  ;;  %s51_s29 = int_to_ptr.vmem [resolvable:$true] %s50_s29 }
  0x26   :  { %p399_p3 = scmp.lt.u32.totalorder %s395_s9, %s577_s5 }
  0x28   :  { %p401_p4 = pnand %p399_p3, %p396_p2 }
  0x2a   :  { %404 = shalt.err (!%p401_p4)
}
  0x2b   :  { %s405_s17 = scalar_lea.vmem %s51_s29, 512  ;;  %p410_p6 = scmp.lt.s32.totalorder %s51_s29, %s51_s29 }
  0x2c   :  { %p406_p5 = scmp.ne.s32.totalorder %s51_s29, %s405_s17  ;;  %p411_p7 = scmp.lt.s32.totalorder %s405_s17, %s405_s17 }
  0x2e   :  { %p412_p8 = por %p411_p7, %p410_p6 }
  0x30   :  { %p413_p9 = pnand %p412_p8, %p406_p5 }
  0x32   :  { %416 = shalt.err (!%p413_p9)
}
  0x33   :  { %56 = dma.hbm_to_vmem [thread:$0]  %s577_s5, 512, %s51_s29, [#allocation6], %s446_s11, %s446_s11, %s447_s12  }
  0x34   :  { %439 = dma.done.wait [#allocation3], 256  }
  0x35   :  { %440 = vsyncadd [#allocation3], 4294967040 }
  0x36   :  { %441 = dma.done.wait [#allocation6], 768  }
  0x37   :  { %442 = vsyncadd [#allocation6], 4294966528  ;;  %v452_v0 = vmov 0.0   ;;  %vm453_vm0 = vmmov 0   ;;  %v341_v1 = vld [vmem:[#allocation5] sm:$0xff]   ;;  %v342_v2 = vld [vmem:[#allocation5 + $0x8] sm:$0xff]  }
  0x38   :  { %311 = vmatprep.subr.bf16.mxu0 %v452_v0  ;;  %315 = vmatprep.mubr.msk.bf16.mxu0 %vm453_vm0, %v452_v0  ;;  %v85_v3 = vld [vmem:[#allocation2] sm:$0xff]  ;;  %v86_v4 = vld [vmem:[#allocation2 + $0x8] sm:$0xff]  ;;  %vm106_vm1 = vcmask 261120   ;;  %vm153_vm2 = vcmask 523264   ;;  %v345_v29 = vld [vmem:[#allocation7 + $0x10] sm:$0xff]  }
  0x39   :  { %319 = vmatprep.subr.bf16.mxu1 %v452_v0  ;;  %327 = vmatprep.mubr.msk.bf16.mxu1 %vm453_vm0, %v452_v0  ;;  %v87_v5 = vpack.c.bf16 %v86_v4, %v85_v3  ;;  %v291_v6 = vld [vmem:[%s574_s2] ss:$0 sm:$0xff]  ;;  %v344_v28 = vld [vmem:[#allocation7 + $0x8] sm:$0xff]   ;;  %v346_v30 = vld [vmem:[#allocation7 + $0x18] sm:$0xff]  }
  0x3a   :  { %312 = vmatpush3.bf16.msra.mxu0 %v341_v1  ;;  %v343_v27 = vld [vmem:[#allocation7] sm:$0xff]  }
  0x3b   :  { %313 = vmatprep.subr.bf16.mxu0 %v452_v0  ;;  %320 = vmatpush3.bf16.msra.mxu1 %v343_v27  ;;  %v295_v37 = vld [vmem:[%s575_s3] ss:$0 sm:$0xff]  ;;  %s454_s3 = smov [#allocation8]  }
  0x3c   :  { %321 = vmatprep.subr.bf16.mxu1 %v452_v0  ;;  %v296_v43 = vld [vmem:[%s576_s4] ss:$0 sm:$0xff]  ;;  %s278_s22 = sshll.u32 %s454_s3, 4  ;;  %s279_s22 = int_to_ptr.vmem [resolvable:$true] %s278_s22 }
  0x3d   :  { %v297_v48 = vld [vmem:[%s578_s6] ss:$0 sm:$0xff]  ;;  %s417_s4 = scalar_lea.vmem %s279_s22, 256  ;;  %p422_p11 = scmp.lt.s32.totalorder %s279_s22, %s279_s22 }
  0x3e   :  { %314 = vmatpush3.bf16.msra.mxu0 %v342_v2  ;;  %p418_p10 = scmp.ne.s32.totalorder %s279_s22, %s417_s4  ;;  %p423_p12 = scmp.lt.s32.totalorder %s417_s4, %s417_s4 }
  0x3f   :  { %322 = vmatpush3.bf16.msra.mxu1 %v344_v28 }
  0x40   :  { %323 = vmatprep.subr.bf16.mxu1 %v452_v0  ;;  %p424_p13 = por %p423_p12, %p422_p11 }
  0x41   :  { %316 = vmatmul.mubr.msk.bf16.vlgmr.msra.gmra.mrb[0].mxu0 %vm106_vm1, %v87_v5 }
  0x42   :  { %p425_p0 = pnand %p424_p13, %p418_p10 }
  0x43   :  { %324 = vmatpush3.bf16.msra.mxu1 %v345_v29 }
  0x44   :  { %325 = vmatprep.subr.bf16.mxu1 %v452_v0 }
  0x47   :  { %326 = vmatpush3.bf16.msra.mxu1 %v346_v30 }
 0x114   :  { %v144_v7 = vpop.f32.mrb[0].mxu0 }
 0x115   :  { %v145_v8 = vadd.f32 %v291_v6, %v144_v7  ;;  %v317_v9 = vpop.f32.mrb[1].mxu0 }
 0x116   :  { %v147_v10 = vpop.f32.mrb[2].mxu0 }
 0x117   :  { %v151_v11 = vmax.f32 %v145_v8, 0.0  ;;  %v148_v12 = vadd.f32 %v291_v6, %v147_v10  ;;  %v318_v13 = vpop.f32.mrb[3].mxu0 }
 0x119   :  { %v152_v14 = vmax.f32 %v148_v12, 0.0  ;;  %v154_v15 = vsel %vm153_vm2, %v151_v11, 0.0 }
 0x11a   :  { %155 = vadd.xlane.f32.xlu0 %v154_v15 }
 0x11b   :  { %v157_v16 = vsel %vm153_vm2, %v152_v14, 0.0 }
 0x11e   :  { %158 = vadd.xlane.f32.xlu0 %v157_v16 }
 0x1a7   :  { %v156_v17 = vpop.xlane.xlu0 %155 }
 0x1a8   :  { %v160_v18 = vmul.f32 0.015625, %v156_v17 }
 0x1aa   :  { %v162_v19 = vsub.f32 %v151_v11, %v160_v18 }
 0x1ab   :  { %v159_v20 = vpop.xlane.xlu0 %158 }
 0x1ac   :  { %v161_v21 = vmul.f32 0.015625, %v159_v20  ;;  %v164_v22 = vmul.f32 %v162_v19, %v162_v19 }
 0x1ae   :  { %v163_v23 = vsub.f32 %v152_v14, %v161_v21  ;;  %v166_v24 = vsel %vm153_vm2, %v164_v22, 0.0 }
 0x1af   :  { %167 = vadd.xlane.f32.xlu1 %v166_v24 }
 0x1b0   :  { %v165_v25 = vmul.f32 %v163_v23, %v163_v23 }
 0x1b2   :  { %v169_v26 = vsel %vm153_vm2, %v165_v25, 0.0 }
 0x1b3   :  { %170 = vadd.xlane.f32.xlu1 %v169_v26 }
 0x23c   :  { %v168_v31 = vpop.xlane.xlu1 %167 }
 0x23d   :  { %v172_v32 = vmul.f32 0.015625, %v168_v31 }
 0x23f   :  { %v174_v33 = vadd.f32 1e-12, %v172_v32 }
 0x240   :  { %v171_v34 = vpop.xlane.xlu1 %170 }
 0x241   :  { %347 = vrsqrt.f32 %v174_v33  ;;  %v173_v35 = vmul.f32 0.015625, %v171_v34 }
 0x243   :  { %v175_v36 = vadd.f32 1e-12, %v173_v35 }
 0x245   :  { %349 = vrsqrt.f32 %v175_v36 }
 0x24b   :  { %v348_v38 = vpop.eup %347 }
 0x24c   :  { %v184_v39 = vmul.f32 %v348_v38, %v295_v37 }
 0x24e   :  { %v186_v42 = vmul.f32 %v184_v39, %v162_v19 }
 0x24f   :  { %v350_v40 = vpop.eup %349 }
 0x250   :  { %v185_v41 = vmul.f32 %v350_v40, %v295_v37  ;;  %v194_v45 = vadd.f32 %v296_v43, %v186_v42 }
 0x252   :  { %v187_v44 = vmul.f32 %v185_v41, %v163_v23 }
 0x254   :  { %v195_v46 = vadd.f32 %v296_v43, %v187_v44 }
 0x256   :  { %v196_v47 = vpack.c.bf16 %v195_v46, %v194_v45 }
 0x258   :  { %328 = vmatmul.mubr.msk.bf16.vlgmr.msra.gmra.mrb[0].mxu1 %vm153_vm2, %v196_v47 }
 0x32b   :  { %v264_v49 = vpop.f32.mrb[0].mxu1 }
 0x32c   :  { %v265_v50 = vadd.f32 %v297_v48, %v264_v49  ;;  %v329_v51 = vpop.f32.mrb[1].mxu1 }
 0x32d   :  { %v267_v52 = vpop.f32.mrb[2].mxu1 }
 0x32e   :  { %271 = vst [vmem:[#allocation8] sm:$0xff] %v265_v50  ;;  %v268_v53 = vadd.f32 %v297_v48, %v267_v52  ;;  %v330_v54 = vpop.f32.mrb[3].mxu1 }
 0x330   :  { %272 = vst [vmem:[#allocation8 + $0x8] sm:$0xff] %v268_v53 }
 0x331   :  { %428 = shalt.err (!%p425_p0)
}
 0x332   :  { %s429_s24 = scalar_lea.hbm %s579_s7, 256 }
 0x333   :  { %p430_p1 = scmp.ne.s32.totalorder %s579_s7, %s429_s24  ;;  %p433_p2 = scmp.lt.u32.totalorder %s429_s24, %s579_s7 }
 0x335   :  { %p435_p3 = pnand %p433_p2, %p430_p1 }
 0x337   :  { %438 = shalt.err (!%p435_p3)
}
 0x338   :  { %284 = dma.vmem_to_hbm [thread:$0]  %s279_s22, 256, %s579_s7, [#allocation4], %s449_s1, %s449_s1, %s450_s25  }
 0x339   :  { %443 = dma.done.wait [#allocation4], 256  }
 0x33a   :  { %444 = vsyncadd [#allocation4], 4294967040 }
 0x33b   :  { %288 = vsyncpa [#allocation3], 1 }
 0x33c   :  { %289 = vsyncpa [#allocation6], 1 }
 0x33d   :  { %290 = vsyncpa [#allocation4], 1 }

</bundles_post_ra>
